<compile_context>
chip_gen: v6e
topology: v6e:2x2x1
jax: 0.10.0
libtpu: 0.0.40
codegen_flags: <defaults>
</compile_context>

<pallas_src>
import jax
import jax.numpy as jnp
from jax.experimental import pallas as pl
from jax.experimental.pallas import tpu as pltpu


def ffn_kernel(x_ref, w1_ref, b1_ref, w2_ref, b2_ref, o_ref, acc_ref):
    # x_ref:  [TM, d_in]   w1_ref: [d_in, TK]   b1_ref: [1, TK]
    # w2_ref: [TK, d_in]   b2_ref: [1, d_in]
    # o_ref:  [TM, d_in]   acc_ref: [TM, d_in] f32 (resident across the k axis)
    k = pl.program_id(1)

    @pl.when(k == 0)
    def _init():
        acc_ref[...] = jnp.zeros_like(acc_ref)

    # First Linear (this hidden chunk) + bias + ReLU; f32 accumulation on MXU.
    x = x_ref[...].astype(w1_ref.dtype)
    h = jnp.dot(x, w1_ref[...], preferred_element_type=jnp.float32)
    h = jnp.maximum(h + b1_ref[...].astype(jnp.float32), 0.0)

    # Dropout: eval-mode identity.
    # TODO(synk): training-mode stochastic dropout (pltpu.prng_seed + stateful_bernoulli).

    # Second Linear: accumulate this hidden chunk's contribution in f32.
    acc_ref[...] += jnp.dot(h.astype(w2_ref.dtype), w2_ref[...],
                            preferred_element_type=jnp.float32)

    @pl.when(k == pl.num_programs(1) - 1)
    def _finalize():
        o_ref[...] = (acc_ref[...] + b2_ref[...].astype(jnp.float32)).astype(o_ref.dtype)


def _round_up(n, m):
    return ((n + m - 1) // m) * m


def _sublane_align(dtype):
    # Min second-to-last-dim tile: 8 rows (4-byte), 16 (2-byte), 32 (1-byte).
    return {4: 8, 2: 16, 1: 32}.get(jnp.dtype(dtype).itemsize, 8)


def _vmem_capacity_bytes():
    try:
        return int(pltpu.get_tpu_info().vmem_capacity_bytes)
    except Exception:
        return 64 << 20  # conservative fallback (v7x per-TensorCore VMEM)


def feed_forward(x, w1, b1, w2, b2, *, tm=512, compute_dtype=None, max_hidden_chunk=None):
    """Eval-mode FFN forward.

    x: [B, S, d_in]; w1: [d_in, d_hid]; b1: [d_hid]; w2: [d_hid, d_in]; b2: [d_in].
    `compute_dtype` (e.g. jnp.bfloat16) casts matmul operands for the MXU fast
    path while keeping f32 accumulation. `max_hidden_chunk` force-caps the
    hidden-dim chunk size (testing / VMEM tuning).
    """
    B, S, d_in = x.shape
    d_hid = w1.shape[1]
    M = B * S
    x2d = x.reshape(M, d_in)

    if compute_dtype is not None:
        w1 = w1.astype(compute_dtype)
        w2 = w2.astype(compute_dtype)
    b1_2d = b1.reshape(1, d_hid)
    b2_2d = b2.reshape(1, d_in)

    x_isz = jnp.dtype(x.dtype).itemsize
    w_isz = jnp.dtype(w1.dtype).itemsize
    b_isz = jnp.dtype(b1.dtype).itemsize
    align = _sublane_align(x.dtype)

    # ---- token-tile sizing (dtype-aware sublane alignment) -------------------
    tm = max(align, min(_round_up(tm, align), _round_up(M, align)))
    # Prefer >= 2 token tiles so the "parallel" axis load-balances across v7x's
    # 2 TensorCores (one extra ~0.35us grid step is noise on v5e/v6e).
    if -(-M // tm) == 1 and M > align:
        tm = max(align, _round_up(-(-M // 2), align))

    # ---- VMEM budgeting (per-generation) -------------------------------------
    capacity = _vmem_capacity_bytes()              # 128 MiB v5e/v6e, 64 MiB v7x
    budget = max(capacity - (8 << 20), 24 << 20)   # leave headroom below physical

    def vmem_need(tm_, tk_):
        nk_ = max(1, d_hid // tk_)
        wbuf = 1 if nk_ == 1 else 2                          # resident vs double-buffered slices
        w_bytes = wbuf * ((d_in * tk_ + tk_ * d_in) * w_isz + tk_ * b_isz)
        w_bytes += d_in * jnp.dtype(b2.dtype).itemsize       # b2, single-buffered
        io_tiles = 2 * (tm_ * d_in * x_isz) * 2              # x + out tiles, double-buffered
        scratch = tm_ * d_in * 4 + tm_ * tk_ * 4             # f32 accumulator + hidden tile
        return w_bytes + io_tiles + scratch + (2 << 20)      # + misc margin

    # Hidden-dim chunking: keep TK a 128-multiple divisor of d_hid so the
    # reduction axis never sees a ragged (garbage-padded) chunk.
    def _tk_too_big(tk_):
        if max_hidden_chunk is not None and tk_ > max_hidden_chunk:
            return True
        return vmem_need(tm, tk_) > budget

    tk = d_hid
    while _tk_too_big(tk) and tk % 2 == 0 and (tk // 2) % 128 == 0:
        tk //= 2
    while vmem_need(tm, tk) > budget and tm > align:
        tm = max(align, _round_up(tm // 2, align))

    nm = -(-M // tm)
    nk = d_hid // tk
    grid = (nm, nk)

    # Grid-invariant operands get a single buffer (fetched once, reused forever).
    def w_spec(shape, imap):
        if nk == 1:
            return pl.BlockSpec(shape, imap, pipeline_mode=pl.Buffered(1))
        return pl.BlockSpec(shape, imap)

    need = vmem_need(tm, tk)
    # Always set the scoped VMEM limit explicitly (v5e default is only ~16 MiB).
    vmem_limit = int(min(budget, max(need, 32 << 20)))

    flops = 4 * M * d_in * d_hid                     # two matmuls
    w_total = int(w1.size) * w_isz + int(w2.size) * w_isz + int(b1.size) * b_isz \
        + int(b2.size) * jnp.dtype(b2.dtype).itemsize
    bytes_accessed = 2 * M * d_in * x_isz + w_total * (nm if nk > 1 else 1)

    out = pl.pallas_call(
        ffn_kernel,
        out_shape=jax.ShapeDtypeStruct((M, d_in), x.dtype),
        grid=grid,
        in_specs=[
            # TODO(synk): if profiling shows exposed x DMA, try pipeline_mode=pl.Buffered(3).
            pl.BlockSpec((tm, d_in), lambda i, k: (i, 0)),          # x: streamed token tile
            w_spec((d_in, tk), lambda i, k: (0, k)),                # w1 hidden slice
            w_spec((1, tk), lambda i, k: (0, k)),                   # b1 hidden slice
            w_spec((tk, d_in), lambda i, k: (k, 0)),                # w2 hidden slice
            pl.BlockSpec((1, d_in), lambda i, k: (0, 0),
                         pipeline_mode=pl.Buffered(1)),             # b2: always resident
        ],
        out_specs=pl.BlockSpec((tm, d_in), lambda i, k: (i, 0)),
        scratch_shapes=[pltpu.VMEM((tm, d_in), jnp.float32)],
        compiler_params=pltpu.CompilerParams(
            dimension_semantics=("parallel", "arbitrary"),
            vmem_limit_bytes=vmem_limit),
        cost_estimate=pl.CostEstimate(
            flops=int(flops), transcendentals=0, bytes_accessed=int(bytes_accessed)),
    )(x2d, w1, b1_2d, w2, b2_2d)

    return out.reshape(B, S, d_in)


def init_params(key, d_input, d_hidden, dtype=jnp.float32):
    """Deterministic PyTorch-style init: U(-1/sqrt(fan_in), 1/sqrt(fan_in))."""
    k1, k2, k3, k4 = jax.random.split(key, 4)
    bound1 = 1.0 / (d_input ** 0.5)
    bound2 = 1.0 / (d_hidden ** 0.5)
    w1 = jax.random.uniform(k1, (d_input, d_hidden), dtype, -bound1, bound1)
    b1 = jax.random.uniform(k2, (d_hidden,), dtype, -bound1, bound1)
    w2 = jax.random.uniform(k3, (d_hidden, d_input), dtype, -bound2, bound2)
    b2 = jax.random.uniform(k4, (d_input,), dtype, -bound2, bound2)
    return w1, b1, w2, b2


if __name__ == "__main__":
    key = jax.random.PRNGKey(0)
    kx, kp = jax.random.split(key)

    # Small but lane-dense shapes: M = 256 tokens -> 2 token tiles (pipeline +
    # megacore axis exercised); d_hidden = 256 -> resident-weight path.
    B, S, d_input, d_hidden = 2, 128, 128, 256
    x = jax.random.normal(kx, (B, S, d_input), jnp.float32)
    w1, b1, w2, b2 = init_params(kp, d_input, d_hidden)

    # Reference (pure JAX, full-precision) eval-mode forward pass.
    h_ref = jnp.maximum(
        jnp.dot(x.reshape(-1, d_input), w1, precision=jax.lax.Precision.HIGHEST) + b1, 0.0)
    y_ref = (jnp.dot(h_ref, w2, precision=jax.lax.Precision.HIGHEST) + b2
             ).reshape(B, S, d_input)

    # 1) Resident-weight path (hidden dim fits in VMEM, single chunk).
    y = jax.block_until_ready(feed_forward(x, w1, b1, w2, b2))
    assert y.shape == (B, S, d_input)
    assert jnp.allclose(y, y_ref, atol=1e-4, rtol=1e-4), float(jnp.max(jnp.abs(y - y_ref)))

    # 2) Hidden-dim-chunked path (forces 2 chunks -> exercises the accumulator).
    y2 = jax.block_until_ready(
        feed_forward(x, w1, b1, w2, b2, max_hidden_chunk=128))
    assert jnp.allclose(y2, y_ref, atol=1e-4, rtol=1e-4), float(jnp.max(jnp.abs(y2 - y_ref)))

    print("KERNEL_OK")
</pallas_src>

<mosaic_0001>
module attributes {stable_mosaic.version = 11 : i64} {
  func.func @ffn_kernel(%arg0: i32, %arg1: i32, %arg2: memref<128x128xf32, #tpu.memory_space<vmem>>, %arg3: memref<128x256xf32, #tpu.memory_space<vmem>>, %arg4: memref<1x256xf32, #tpu.memory_space<vmem>>, %arg5: memref<256x128xf32, #tpu.memory_space<vmem>>, %arg6: memref<1x128xf32, #tpu.memory_space<vmem>>, %arg7: memref<128x128xf32, #tpu.memory_space<vmem>>, %arg8: memref<128x128xf32, #tpu.memory_space<vmem>>) attributes {dimension_semantics = [#tpu.dimension_semantics<parallel>, #tpu.dimension_semantics<arbitrary>], iteration_bounds = array<i64: 2, 1>, scalar_prefetch = 0 : i64, scratch_operands = 1 : i64, tpu.core_type = #tpu.core_type<tc>, window_params = [{transform_indices = @transform_0, window_bounds = array<i64: 128, 128>}, {pipeline_mode = #tpu.pipeline_mode<synchronous>, transform_indices = @transform_1, window_bounds = array<i64: 128, 256>}, {pipeline_mode = #tpu.pipeline_mode<synchronous>, transform_indices = @transform_2, window_bounds = array<i64: 1, 256>}, {pipeline_mode = #tpu.pipeline_mode<synchronous>, transform_indices = @transform_3, window_bounds = array<i64: 256, 128>}, {pipeline_mode = #tpu.pipeline_mode<synchronous>, transform_indices = @transform_4, window_bounds = array<i64: 1, 128>}, {transform_indices = @transform_5, window_bounds = array<i64: 128, 128>}]} {
    %c0_i32 = arith.constant 0 : i32
    %0 = arith.cmpi eq, %arg1, %c0_i32 : i32
    %1 = arith.extui %0 : i1 to i32
    %c0_i32_0 = arith.constant 0 : i32
    %2 = arith.cmpi ne, %1, %c0_i32_0 : i32
    scf.if %2 {
      %cst_16 = arith.constant 0.000000e+00 : f32
      %19 = vector.broadcast %cst_16 : f32 to vector<128x128xf32>
      %c0_17 = arith.constant 0 : index
      %c0_18 = arith.constant 0 : index
      %20 = vector.load %arg8[%c0_17, %c0_18] : memref<128x128xf32, #tpu.memory_space<vmem>>, vector<128x128xf32>
      tpu.vector_store %arg8[%c0_17, %c0_18], %19 {strides = array<i32>} : memref<128x128xf32, #tpu.memory_space<vmem>>, vector<128x128xf32>,
    } else {
    }
    %c0 = arith.constant 0 : index
    %c0_1 = arith.constant 0 : index
    %3 = vector.load %arg2[%c0, %c0_1] : memref<128x128xf32, #tpu.memory_space<vmem>>, vector<128x128xf32>
    %c0_2 = arith.constant 0 : index
    %c0_3 = arith.constant 0 : index
    %4 = vector.load %arg3[%c0_2, %c0_3] : memref<128x256xf32, #tpu.memory_space<vmem>>, vector<128x256xf32>
    %cst = arith.constant dense<0.000000e+00> : vector<128x256xf32>
    %5 = tpu.matmul %3, %4, %cst {dimension_numbers = #tpu.dot_dimension_numbers<[1], [0], [0], [1], [0, 0, 1, 1], [], []>} : vector<128x128xf32>, vector<128x256xf32>, vector<128x256xf32> -> vector<128x256xf32>
    %c0_4 = arith.constant 0 : index
    %c0_5 = arith.constant 0 : index
    %6 = vector.load %arg4[%c0_4, %c0_5] : memref<1x256xf32, #tpu.memory_space<vmem>>, vector<1x256xf32>
    %7 = vector.broadcast %6 : vector<1x256xf32> to vector<128x256xf32>
    %8 = arith.addf %5, %7 : vector<128x256xf32>
    %cst_6 = arith.constant 0.000000e+00 : f32
    %9 = vector.broadcast %cst_6 : f32 to vector<128x256xf32>
    %10 = arith.maximumf %8, %9 : vector<128x256xf32>
    %c0_7 = arith.constant 0 : index
    %c0_8 = arith.constant 0 : index
    %11 = vector.load %arg8[%c0_7, %c0_8] : memref<128x128xf32, #tpu.memory_space<vmem>>, vector<128x128xf32>
    %c0_9 = arith.constant 0 : index
    %c0_10 = arith.constant 0 : index
    %12 = vector.load %arg5[%c0_9, %c0_10] : memref<256x128xf32, #tpu.memory_space<vmem>>, vector<256x128xf32>
    %cst_11 = arith.constant dense<0.000000e+00> : vector<128x128xf32>
    %13 = tpu.matmul %10, %12, %cst_11 {dimension_numbers = #tpu.dot_dimension_numbers<[1], [0], [0], [1], [0, 0, 1, 1], [], []>} : vector<128x256xf32>, vector<256x128xf32>, vector<128x128xf32> -> vector<128x128xf32>
    %14 = arith.addf %11, %13 : vector<128x128xf32>
    %c0_12 = arith.constant 0 : index
    %c0_13 = arith.constant 0 : index
    %15 = vector.load %arg8[%c0_12, %c0_13] : memref<128x128xf32, #tpu.memory_space<vmem>>, vector<128x128xf32>
    tpu.vector_store %arg8[%c0_12, %c0_13], %14 {strides = array<i32>} : memref<128x128xf32, #tpu.memory_space<vmem>>, vector<128x128xf32>,
    %c0_i32_14 = arith.constant 0 : i32
    %16 = arith.cmpi eq, %arg1, %c0_i32_14 : i32
    %17 = arith.extui %16 : i1 to i32
    %c0_i32_15 = arith.constant 0 : i32
    %18 = arith.cmpi ne, %17, %c0_i32_15 : i32
    scf.if %18 {
      %c0_16 = arith.constant 0 : index
      %c0_17 = arith.constant 0 : index
      %19 = vector.load %arg8[%c0_16, %c0_17] : memref<128x128xf32, #tpu.memory_space<vmem>>, vector<128x128xf32>
      %c0_18 = arith.constant 0 : index
      %c0_19 = arith.constant 0 : index
      %20 = vector.load %arg6[%c0_18, %c0_19] : memref<1x128xf32, #tpu.memory_space<vmem>>, vector<1x128xf32>
      %21 = vector.broadcast %20 : vector<1x128xf32> to vector<128x128xf32>
      %22 = arith.addf %19, %21 : vector<128x128xf32>
      %c0_20 = arith.constant 0 : index
      %c0_21 = arith.constant 0 : index
      %23 = vector.load %arg7[%c0_20, %c0_21] : memref<128x128xf32, #tpu.memory_space<vmem>>, vector<128x128xf32>
      tpu.vector_store %arg7[%c0_20, %c0_21], %22 {strides = array<i32>} : memref<128x128xf32, #tpu.memory_space<vmem>>, vector<128x128xf32>,
    } else {
    }
    return
  }
  func.func @transform_0(%arg0: i32, %arg1: i32) -> (i32, i32) {
    %c0_i32 = arith.constant 0 : i32
    %c0_i32_0 = arith.constant 0 : i32
    return %arg0, %c0_i32 : i32, i32
  }
  func.func @transform_1(%arg0: i32, %arg1: i32) -> (i32, i32) {
    %c0_i32 = arith.constant 0 : i32
    %c0_i32_0 = arith.constant 0 : i32
    return %c0_i32, %arg1 : i32, i32
  }
  func.func @transform_2(%arg0: i32, %arg1: i32) -> (i32, i32) {
    %c0_i32 = arith.constant 0 : i32
    %c0_i32_0 = arith.constant 0 : i32
    return %c0_i32, %arg1 : i32, i32
  }
  func.func @transform_3(%arg0: i32, %arg1: i32) -> (i32, i32) {
    %c0_i32 = arith.constant 0 : i32
    %c0_i32_0 = arith.constant 0 : i32
    return %arg1, %c0_i32 : i32, i32
  }
  func.func @transform_4(%arg0: i32, %arg1: i32) -> (i32, i32) {
    %c0_i32 = arith.constant 0 : i32
    %c0_i32_0 = arith.constant 0 : i32
    %c0_i32_1 = arith.constant 0 : i32
    return %c0_i32, %c0_i32_0 : i32, i32
  }
  func.func @transform_5(%arg0: i32, %arg1: i32) -> (i32, i32) {
    %c0_i32 = arith.constant 0 : i32
    %c0_i32_0 = arith.constant 0 : i32
    return %arg0, %c0_i32 : i32, i32
  }
}

</mosaic_0001>

<bundles_post_ra>
// kernel: tpu_custom_call.1
= control target key start
LH: loop header
LB: loop body
LE: loop exit
PB: predicated region body
PF: predicated region fallthrough
CT: control target
= control target key end

     0   :  { %s1720_s0 = inlined_call_operand.hbm [shape: f32[256,128], index: 0, kind: input, shape index: {}]   ;;  %s1721_s1 = inlined_call_operand.hbm [shape: f32[128,256], index: 1, kind: input, shape index: {}]   ;;  %s1722_s2 = inlined_call_operand.vmem [shape: f32[1,256], index: 2, kind: input, shape index: {}]   ;;  %s1723_s3 = inlined_call_operand.hbm [shape: f32[256,128], index: 3, kind: input, shape index: {}]   ;;  %s1724_s4 = inlined_call_operand.vmem [shape: f32[1,128], index: 4, kind: input, shape index: {}]   ;;  %s1725_s5 = inlined_call_operand.hbm [shape: f32[256,128], index: 5, kind: output, shape index: {}]  }
   0x1   :  { %1731 = sst [smem:[#allocation13_spill]] %s1721_s1 }
   0x2   :  { %10 = vsyncpa [#allocation4], 0 }
   0x3   :  { %12 = vsyncpa [#allocation4 + $0x1], 0 }
   0x4   :  { %13 = vsyncpa [#allocation7], 0 }
   0x5   :  { %14 = vsyncpa [#allocation5], 0 }
   0x6   :  { %16 = vsyncpa [#allocation5 + $0x1], 0  ;;  %s1409_s18 = smov 0   ;;  %s1411_s19 = smov 0  }
   0x7   :  { %s1413_s20 = smov 0   ;;  %s1415_s21 = smov 0  }
   0x8   :  { %s1417_s22 = smov 0   ;;  %s1419_s23 = smov 0  }
   0x9 LB: > { %s1009_s24 = sadd.s32 4294967295, %s1366_s23   ;;  %s1010_s25 = sadd.s32 4294967294, %s1366_s23   ;;  %s1366_s23 = sphi %s1419_s23, %s22_s23   ;;  %s1362_s22 = sphi %s1417_s22, %s1751_s22   ;;  %s1358_s21 = sphi %s1415_s21, %s1750_s21   ;;  %s1354_s20 = sphi %s1413_s20, %s1749_s20   ;;  %s1350_s19 = sphi %s1411_s19, %s1748_s19   ;;  %s1346_s18 = sphi %s1409_s18, %s1747_s18  }
   0xa   : > { %p54_p0 = scmp.ne.s32.totalorder %s1350_s19, %s1346_s18  ;;  %p1443_p1 = scmp.eq.s32.totalorder %s1009_s24, 0 }
   0xb   : > { %p1447_p2 = scmp.eq.s32.totalorder %s1009_s24, 1  ;;  %p183_p3 = scmp.eq.s32.totalorder %s1010_s25, 1 }
   0xc   : > { %s1732_s26 = scalar_select %p1443_p1, 1, 0 }
   0xd   : > { %p1453_p4 = por %p1443_p1, %p54_p0  ;;  %p1011_p5 = scmp.ge.s32.totalorder %s1366_s23, 1 }
   0xe   : > { %p1458_p6 = por %p183_p3, %p54_p0  ;;  %p190_p7 = scmp.lt.s32.totalorder %s1366_s23, 3 }
   0xf   : > { %s1734_s28 = scalar_select %p1453_p4, 1, 0 }
  0x10   : > { %s1735_s29 = scalar_select %p1458_p6, 1, 0 }
  0x11   : > { %p1463_p8 = pnand %p1011_p5, %p190_p7  ;;  %s1368_s6 = smov [#allocation6]  }
  0x12   : > { %s205_s7 = sshll.u32 %s1368_s6, 4  ;;  %s1369_s9 = smov [#allocation8]   ;;  %s206_s7 = int_to_ptr.vmem [resolvable:$true] %s205_s7 }
  0x13   : > { %p1124_p9 = pneg %p1463_p8  ;;  %s229_s10 = sshll.u32 %s1369_s9, 4  ;;  %s230_s10 = int_to_ptr.vmem [resolvable:$true] %s229_s10 }
  0x14   : > { %s1213_s11 = scalar_lea.vmem %s206_s7, 4096  ;;  %p1221_p5 = scmp.lt.s32.totalorder %s206_s7, %s206_s7 }
  0x15   : > { %p1472_p11 = pnand %p1124_p9, %p1443_p1  ;;  %p1214_p13 = scmp.ne.s32.totalorder %s206_s7, %s1213_s11 }
  0x16   : > { %p1222_p7 = scmp.lt.s32.totalorder %s1213_s11, %s1213_s11 }
  0x17   : > { %p1204_p12 = pneg %p1472_p11 }
  0x18   : > { %p1223_p10 = por %p1222_p7, %p1221_p5 }
  0x19   : > { %p1216_p0 = pnand %p1214_p13, %p1204_p12 }
  0x1b   : > { %p1217_p3 = pneg %p1216_p0 }
  0x1d   : > { %p1224_p9 = pnand %p1223_p10, %p1217_p3 }
  0x1f   : > { %1227 = shalt.err (!%p1224_p9)
}
  0x20   : > { %s1370_s12 = smov 256   ;;  %s1371_s13 = smov 16  }
  0x21   : > { %s1738_s1 = sld [smem:[#allocation13_spill]]  ;;  %s1239_s16 = scalar_lea.vmem %s230_s10, 4096 }
  0x22   : > { %p1240_p6 = scmp.ne.s32.totalorder %s230_s10, %s1239_s16  ;;  %p1247_p1 = scmp.lt.s32.totalorder %s230_s10, %s230_s10 }
  0x23   : > { %p1248_p4 = scmp.lt.s32.totalorder %s1239_s16, %s1239_s16 }
  0x24   : > { %p1242_p13 = pnand %p1240_p6, %p1204_p12 }
  0x25   : > { %p1249_p5 = por %p1248_p4, %p1247_p1 }
  0x26   : > { %p1243_p0 = pneg %p1242_p13 }
  0x27   : > { %1127 = dma.hbm_to_vmem [thread:$0]  (!%p1472_p11), %s1738_s1, 4096, %s206_s7, [#allocation7], %s1370_s12, %s1370_s12, %s1371_s13  }
  0x28   : > { %p1250_p10 = pnand %p1249_p5, %p1243_p0 }
  0x2a   : > { %1253 = shalt.err (!%p1250_p10)
}
  0x2b   : > { %s1729_s17 = smov 128   ;;  %s1730_s24 = smov 8  }
  0x2c   : > { %1130 = dma.hbm_to_vmem [thread:$0]  (!%p1472_p11), %s1723_s3, 4096, %s230_s10, [#allocation7], %s1729_s17, %s1729_s17, %s1730_s24  }
  0x2d   : > { %s34_s7 = sadd.s32 1, %s1362_s22  ;;  %s41_s9 = sadd.s32 1, %s1354_s20 }
  0x2e   : > { %p36_p1 = scmp.ge.s32.totalorder %s34_s7, 2  ;;  %p48_p4 = scmp.ne.s32.totalorder %s1354_s20, %s1350_s19 }
  0x2f   : > { %p49_p6 = scmp.eq.s32.totalorder %s1366_s23, 0  ;;  %p1141_p12 = scmp.lt.s32.totalorder %s1366_s23, 2 }
  0x30   : > { %s1753_s7 = smov (%p36_p1, %s34_s7), 0  ;;  %p1507_p7 = por %p1447_p2, %p48_p4 }
  0x31   : > { %p50_p3 = por %p49_p6, %p48_p4  ;;  %s38_s11 = ssub.s32 %s1362_s22, %s1753_s7 }
  0x32   : > { %s246_s12 = sand.u32 1, %s1354_s20   ;;  %p39_p9 = scmp.eq.s32.totalorder %s38_s11, 0 }
  0x33   : > { %s1016_s10 = sshll.u32 %s246_s12, 7  ;;  %s1030_s13 = sshll.u32 %s1362_s22, 11 }
  0x34   : > { %s1516_s14 = scalar_select %p39_p9, %s1354_s20, %s41_s9  }
  0x35   : > { %s256_s25 = scalar_lea.hbm %s1720_s0, %s1030_s13  ;;  %s250_s6 = scalar_lea.vmem [#allocation3], %s1016_s10 }
  0x36   : > { %s257_s17 = sshll.u32 %s250_s6, 4  ;;  %p1523_p11 = pnand %p1141_p12, %p50_p3  ;;  %s258_s17 = int_to_ptr.vmem [resolvable:$true] %s257_s17 }
  0x37   : > { %s247_s24 = scalar_lea.sflag [#allocation4], %s246_s12  ;;  %s1267_s11 = scalar_lea.vmem %s258_s17, 2048 }
  0x38   : > { %p1256_p2 = pneg %p1523_p11  ;;  %p1268_p13 = scmp.ne.s32.totalorder %s258_s17, %s1267_s11 }
  0x39   : > { %s1374_s9 = smov [#allocation3]  }
  0x3a   : > { %p1270_p0 = pnand %p1268_p13, %p1256_p2  ;;  %s1272_s1 = sshll.u32 %s1374_s9, 4  ;;  %s1273_s1 = int_to_ptr.vmem [resolvable:$false] %s1272_s1 }
  0x3b   : > { %s1274_s13 = scalar_lea.vmem %s1273_s1, 4096  ;;  %p1275_p10 = scmp.lt.s32.totalorder %s258_s17, %s1273_s1 }
  0x3c   : > { %p1271_p5 = pneg %p1270_p0  ;;  %p1276_p1 = scmp.lt.s32.totalorder %s1274_s13, %s1267_s11 }
  0x3e   : > { %p1277_p4 = por %p1276_p1, %p1275_p10 }
  0x40   : > { %p1278_p6 = pnand %p1277_p4, %p1271_p5 }
  0x42   : > { %1281 = shalt.err (!%p1278_p6)
}
  0x43   : > { %s1741_s10 = smov 8   ;;  %s1742_s15 = smov 128  }
  0x44   : > { %1134 = dma.hbm_to_vmem [thread:$0]  (!%p1523_p11), %s256_s25, 2048, %s258_s17, %s247_s24, %s1742_s15, %s1742_s15, %s1741_s10  }
  0x45   : > { %269 = sbr.rel (%p1463_p8) target bundleno = 584 (0x248), region = 40  ;;  %s1537_s12 = sand.u32 (!%p1463_p8), 1, %s1350_s19  }
  0x46   : > { %s1020_s1 = sshll.u32 (!%p1463_p8), %s1537_s12, 7  ;;  %s272_s16 = scalar_lea.sflag (!%p1463_p8), [#allocation4], %s1537_s12 }
  0x47   : > { %s1543_s6 = scalar_lea.vmem (!%p1463_p8), [#allocation3], %s1020_s1  ;;  %p1743_p12 = scmp.ne.s32.totalorder (!%p1463_p8), %s1734_s28, 0 }
  0x4a   : > { %1333 = dma.done.wait (%p1743_p12), %s272_s16, 2048  }
  0x4b   : > { %1335 = vsyncadd (%p1743_p12), %s272_s16, 4294965248  ;;  %p1744_p3 = scmp.ne.s32.totalorder %s1732_s26, 0 }
  0x4d   : > { %1337 = dma.done.wait (%p1744_p3), [#allocation7], 8192  }
  0x4e   : > { %1339 = vsyncadd (%p1744_p3), [#allocation7], 4294959104  ;;  %v1375_v0 = vmov 0.0   ;;  %v390_v1 = vld [vmem:[#allocation6 + $0xf8] sm:$0xff]  ;;  %v389_v2 = vld [vmem:[#allocation6 + $0xf0] sm:$0xff]  ;;  %s1632_s24 = scalar_lea.vmem [#allocation9], %s1020_s1 }
  0x4f   : > { %467 = vmatprep.mubr.f32.mxu0 %v1375_v0  ;;  %v388_v3 = vld [vmem:[#allocation6 + $0xe8] sm:$0xff]  ;;  %403 = vmatprep.subr.mxu0 %v390_v1  ;;  %v387_v4 = vld [vmem:[#allocation6 + $0xe0] sm:$0xff]  ;;  %v386_v5 = vld [vmem:[#allocation6 + $0xd8] sm:$0xff]  ;;  %s1031_s25 = sshll.u32 %s1358_s21, 11  ;;  %s893_s27 = sshll.u32 %s1632_s24, 4  ;;  %s1670_s27 = int_to_ptr.vmem [resolvable:$true] %s893_s27 }
  0x50   : > { %404 = vmatpush1.msra.mxu0 %v389_v2  ;;  %v385_v6 = vld [vmem:[#allocation6 + $0xd0] sm:$0xff]  ;;  %v384_v7 = vld [vmem:[#allocation6 + $0xc8] sm:$0xff]  ;;  %v383_v8 = vld [vmem:[#allocation6 + $0xc0] sm:$0xff]  ;;  %s1668_s13 = scalar_lea.hbm %s1725_s5, %s1031_s25  ;;  %s880_s10 = scalar_lea.sflag [#allocation5], %s1537_s12 }
  0x51   : > { %405 = vmatprep.subr.mxu0 %v388_v3  ;;  %v382_v9 = vld [vmem:[#allocation6 + $0xb8] sm:$0xff]  ;;  %v381_v10 = vld [vmem:[#allocation6 + $0xb0] sm:$0xff]  ;;  %v380_v11 = vld [vmem:[#allocation6 + $0xa8] sm:$0xff]  ;;  %s1282_s15 = scalar_lea.vmem %s1670_s27, 2048  ;;  %s1376_s21 = smov [#allocation9]  }
  0x52   : > { %406 = vmatpush1.msra.mxu0 %v387_v4  ;;  %v379_v12 = vld [vmem:[#allocation6 + $0xa0] sm:$0xff]  ;;  %v378_v13 = vld [vmem:[#allocation6 + $0x98] sm:$0xff]  ;;  %v377_v14 = vld [vmem:[#allocation6 + $0x90] sm:$0xff]  ;;  %p1283_p8 = scmp.ne.s32.totalorder %s1670_s27, %s1282_s15  ;;  %s1286_s1 = sshll.u32 %s1376_s21, 4  ;;  %s1287_s1 = int_to_ptr.vmem [resolvable:$false] %s1286_s1 }
  0x53   : > { %407 = vmatprep.subr.mxu0 %v386_v5  ;;  %v376_v15 = vld [vmem:[#allocation6 + $0x88] sm:$0xff]  ;;  %v375_v16 = vld [vmem:[#allocation6 + $0x80] sm:$0xff]  ;;  %v374_v17 = vld [vmem:[#allocation6 + $0x78] sm:$0xff]  ;;  %s1288_s16 = scalar_lea.vmem %s1287_s1, 4096  ;;  %p1289_p2 = scmp.lt.s32.totalorder %s1670_s27, %s1287_s1 }
  0x54   : > { %408 = vmatpush1.msra.mxu0 %v385_v6  ;;  %v373_v18 = vld [vmem:[#allocation6 + $0x70] sm:$0xff]  ;;  %v372_v19 = vld [vmem:[#allocation6 + $0x68] sm:$0xff]  ;;  %v643_v20 = vld [vmem:[#allocation8 + $0xf8] sm:$0xff]  ;;  %p1284_p9 = pnand %p1283_p8, %p1507_p7  ;;  %p1290_p13 = scmp.lt.s32.totalorder %s1288_s16, %s1282_s15 }
  0x55   : > { %409 = vmatprep.subr.mxu0 %v384_v7  ;;  %v627_v21 = vld [vmem:[#allocation8 + $0x78] sm:$0xff]  ;;  %v642_v22 = vld [vmem:[#allocation8 + $0xf0] sm:$0xff]  ;;  %v371_v23 = vld [vmem:[#allocation6 + $0x60] sm:$0xff]  ;;  %1032 = vmatprep.subr.mxu1 %v643_v20 }
  0x56   : > { %410 = vmatpush1.msra.mxu0 %v383_v8  ;;  %v626_v24 = vld [vmem:[#allocation8 + $0x70] sm:$0xff]  ;;  %v370_v25 = vld [vmem:[#allocation6 + $0x58] sm:$0xff]  ;;  %1033 = vmatpush3.msra.mxu1 %v627_v21  ;;  %v641_v26 = vld [vmem:[#allocation8 + $0xe8] sm:$0xff]  ;;  %p1285_p11 = pneg %p1284_p9  ;;  %p1291_p0 = por %p1290_p13, %p1289_p2 }
  0x57   : > { %411 = vmatprep.subr.mxu0 %v382_v9  ;;  %v369_v27 = vld [vmem:[#allocation6 + $0x50] sm:$0xff]  ;;  %1034 = vmatprep.subr.mxu1 %v642_v22  ;;  %v625_v28 = vld [vmem:[#allocation8 + $0x68] sm:$0xff]  ;;  %v640_v30 = vld [vmem:[#allocation8 + $0xe0] sm:$0xff] }
  0x58   : > { %412 = vmatpush1.msra.mxu0 %v381_v10  ;;  %v368_v29 = vld [vmem:[#allocation6 + $0x48] sm:$0xff]  ;;  %1035 = vmatpush3.msra.mxu1 %v626_v24  ;;  %v367_v31 = vld [vmem:[#allocation6 + $0x40] sm:$0xff]  ;;  %v366_v33 = vld [vmem:[#allocation6 + $0x38] sm:$0xff]  ;;  %p1292_p5 = pnand %p1291_p0, %p1285_p11 }
  0x59   : > { %413 = vmatprep.subr.mxu0 %v380_v11  ;;  %1036 = vmatprep.subr.mxu1 %v641_v26  ;;  %v624_v32 = vld [vmem:[#allocation8 + $0x60] sm:$0xff]  ;;  %v639_v34 = vld [vmem:[#allocation8 + $0xd8] sm:$0xff]  ;;  %v365_v35 = vld [vmem:[#allocation6 + $0x30] sm:$0xff] }
  0x5a   : > { %414 = vmatpush1.msra.mxu0 %v379_v12  ;;  %1037 = vmatpush3.msra.mxu1 %v625_v28  ;;  %v623_v36 = vld [vmem:[#allocation8 + $0x58] sm:$0xff]  ;;  %v364_v37 = vld [vmem:[#allocation6 + $0x28] sm:$0xff]  ;;  %v638_v38 = vld [vmem:[#allocation8 + $0xd0] sm:$0xff] }
  0x5b   : > { %415 = vmatprep.subr.mxu0 %v378_v13  ;;  %1038 = vmatprep.subr.mxu1 %v640_v30  ;;  %v363_v39 = vld [vmem:[#allocation6 + $0x20] sm:$0xff]  ;;  %v622_v40 = vld [vmem:[#allocation8 + $0x50] sm:$0xff]  ;;  %v362_v41 = vld [vmem:[#allocation6 + $0x18] sm:$0xff] }
  0x5c   : > { %416 = vmatpush1.msra.mxu0 %v377_v14  ;;  %1039 = vmatpush3.msra.mxu1 %v624_v32  ;;  %v637_v42 = vld [vmem:[#allocation8 + $0xc8] sm:$0xff]  ;;  %v361_v43 = vld [vmem:[#allocation6 + $0x10] sm:$0xff]  ;;  %v636_v46 = vld [vmem:[#allocation8 + $0xc0] sm:$0xff] }
  0x5d   : > { %417 = vmatprep.subr.mxu0 %v376_v15  ;;  %1040 = vmatprep.subr.mxu1 %v639_v34  ;;  %v621_v44 = vld [vmem:[#allocation8 + $0x48] sm:$0xff]  ;;  %v359_v47 = vld [vmem:[#allocation6] sm:$0xff]  ;;  %v635_v50 = vld [vmem:[#allocation8 + $0xb8] sm:$0xff] }
  0x5e   : > { %418 = vmatpush1.msra.mxu0 %v375_v16  ;;  %1041 = vmatpush3.msra.mxu1 %v623_v36  ;;  %v360_v45 = vld [vmem:[#allocation6 + $0x8] sm:$0xff]  ;;  %v620_v48 = vld [vmem:[#allocation8 + $0x40] sm:$0xff]  ;;  %v619_v51 = vld [vmem:[#allocation8 + $0x38] sm:$0xff] }
  0x5f   : > { %419 = vmatprep.subr.mxu0 %v374_v17  ;;  %1042 = vmatprep.subr.mxu1 %v638_v38  ;;  %v343_v49 = vld [vmem:[%s1543_s6] sm:$0xff]  ;;  %v634_v52 = vld [vmem:[#allocation8 + $0xb0] sm:$0xff]  ;;  %v344_v54 = vld [vmem:[%s1543_s6 + $0x8] sm:$0xff] }
  0x60   : > { %420 = vmatpush1.msra.mxu0 %v373_v18  ;;  %1043 = vmatpush3.msra.mxu1 %v622_v40  ;;  %v618_v53 = vld [vmem:[#allocation8 + $0x30] sm:$0xff]  ;;  %v633_v55 = vld [vmem:[#allocation8 + $0xa8] sm:$0xff]  ;;  %v632_v57 = vld [vmem:[#allocation8 + $0xa0] sm:$0xff]  ;;  %v393_v18 = vlaneseq }
  0x61   : > { %421 = vmatprep.subr.mxu0 %v372_v19  ;;  %1044 = vmatprep.subr.mxu1 %v637_v42  ;;  %v617_v56 = vld [vmem:[#allocation8 + $0x28] sm:$0xff]  ;;  %v616_v58 = vld [vmem:[#allocation8 + $0x20] sm:$0xff]  ;;  %v345_v59 = vld [vmem:[%s1543_s6 + $0x10] sm:$0xff] }
  0x62   : > { %422 = vmatpush1.msra.mxu0 %v371_v23  ;;  %1045 = vmatpush3.msra.mxu1 %v621_v44  ;;  %v346_v60 = vld [vmem:[%s1543_s6 + $0x18] sm:$0xff]  ;;  %v347_v61 = vld [vmem:[%s1543_s6 + $0x20] sm:$0xff]  ;;  %v348_v62 = vld [vmem:[%s1543_s6 + $0x28] sm:$0xff] }
  0x63   : > { %423 = vmatprep.subr.mxu0 %v370_v25  ;;  %1046 = vmatprep.subr.mxu1 %v636_v46  ;;  %v349_v63 = vld [vmem:[%s1543_s6 + $0x30] sm:$0xff]  ;;  %v350_v1 = vld [vmem:[%s1543_s6 + $0x38] sm:$0xff]  ;;  %v351_v2 = vld [vmem:[%s1543_s6 + $0x40] sm:$0xff] }
  0x64   : > { %424 = vmatpush1.msra.mxu0 %v369_v27  ;;  %1047 = vmatpush3.msra.mxu1 %v620_v48  ;;  %v352_v3 = vld [vmem:[%s1543_s6 + $0x48] sm:$0xff]  ;;  %v353_v4 = vld [vmem:[%s1543_s6 + $0x50] sm:$0xff]  ;;  %v354_v5 = vld [vmem:[%s1543_s6 + $0x58] sm:$0xff] }
  0x65   : > { %425 = vmatprep.subr.mxu0 %v368_v29  ;;  %1048 = vmatprep.subr.mxu1 %v635_v50  ;;  %v355_v6 = vld [vmem:[%s1543_s6 + $0x60] sm:$0xff]  ;;  %v356_v7 = vld [vmem:[%s1543_s6 + $0x68] sm:$0xff]  ;;  %v357_v8 = vld [vmem:[%s1543_s6 + $0x70] sm:$0xff] }
  0x66   : > { %426 = vmatpush1.msra.mxu0 %v367_v31  ;;  %1049 = vmatpush3.msra.mxu1 %v619_v51  ;;  %v358_v9 = vld [vmem:[%s1543_s6 + $0x78] sm:$0xff]  ;;  %v630_v12 = vld [vmem:[#allocation8 + $0x90] sm:$0xff]  ;;  %v629_v14 = vld [vmem:[#allocation8 + $0x88] sm:$0xff] }
  0x67   : > { %427 = vmatprep.subr.mxu0 %v366_v33  ;;  %1050 = vmatprep.subr.mxu1 %v634_v52  ;;  %v631_v10 = vld [vmem:[#allocation8 + $0x98] sm:$0xff]  ;;  %v614_v13 = vld [vmem:[#allocation8 + $0x10] sm:$0xff]  ;;  %v613_v15 = vld [vmem:[#allocation8 + $0x8] sm:$0xff] }
  0x68   : > { %428 = vmatpush1.msra.mxu0 %v365_v35  ;;  %1051 = vmatpush3.msra.mxu1 %v618_v53  ;;  %v615_v11 = vld [vmem:[#allocation8 + $0x18] sm:$0xff]  ;;  %v628_v16 = vld [vmem:[#allocation8 + $0x80] sm:$0xff] }
  0x69   : > { %429 = vmatprep.subr.mxu0 %v364_v37  ;;  %1052 = vmatprep.subr.mxu1 %v633_v55  ;;  %v612_v17 = vld [vmem:[#allocation8] sm:$0xff] }
  0x6a   : > { %430 = vmatpush1.msra.mxu0 %v363_v39  ;;  %1053 = vmatpush3.msra.mxu1 %v617_v56  ;;  %v391_v20 = vld [vmem:[%s1722_s2] sm:$0x3] }
  0x6b   : > { %431 = vmatprep.subr.mxu0 %v362_v41  ;;  %1054 = vmatprep.subr.mxu1 %v632_v57 }
  0x6c   : > { %432 = vmatpush1.msra.mxu0 %v361_v43  ;;  %1055 = vmatpush3.msra.mxu1 %v616_v58 }
  0x6d   : > { %433 = vmatprep.subr.mxu0 %v360_v45  ;;  %1056 = vmatprep.subr.mxu1 %v631_v10 }
  0x6e   : > { %434 = vmatpush1.msra.mxu0 %v359_v47  ;;  %1057 = vmatpush3.msra.mxu1 %v615_v11 }
  0x6f   : > { %468 = vmatmul.mubr.f32.vlgmr.msra.gmra.mxu0 %v343_v49  ;;  %1058 = vmatprep.subr.mxu1 %v630_v12 }
  0x70   : > { %473 = vmatprep.mubr.f32.mxu0 %v1375_v0  ;;  %1059 = vmatpush3.msra.mxu1 %v614_v13 }
  0x71   : > { %1060 = vmatprep.subr.mxu1 %v629_v14 }
  0x72   : > { %1061 = vmatpush3.msra.mxu1 %v613_v15 }
  0x73   : > { %474 = vmatmul.mubr.f32.gmra.mxu0 %v344_v54  ;;  %1062 = vmatprep.subr.mxu1 %v628_v16 }
  0x74   : > { %479 = vmatprep.mubr.f32.mxu0 %v1375_v0  ;;  %1063 = vmatpush3.msra.mxu1 %v612_v17 }
  0x77   : > { %480 = vmatmul.mubr.f32.gmra.mxu0 %v345_v59 }
  0x78   : > { %485 = vmatprep.mubr.f32.mxu0 %v1375_v0 }
  0x7b   : > { %486 = vmatmul.mubr.f32.gmra.mxu0 %v346_v60 }
  0x7c   : > { %491 = vmatprep.mubr.f32.mxu0 %v1375_v0 }
  0x7f   : > { %492 = vmatmul.mubr.f32.gmra.mxu0 %v347_v61 }
  0x80   : > { %497 = vmatprep.mubr.f32.mxu0 %v1375_v0 }
  0x83   : > { %498 = vmatmul.mubr.f32.gmra.mxu0 %v348_v62 }
  0x84   : > { %503 = vmatprep.mubr.f32.mxu0 %v1375_v0 }
  0x87   : > { %504 = vmatmul.mubr.f32.gmra.mxu0 %v349_v63 }
  0x88   : > { %509 = vmatprep.mubr.f32.mxu0 %v1375_v0 }
  0x8b   : > { %510 = vmatmul.mubr.f32.gmra.mxu0 %v350_v1 }
  0x8c   : > { %515 = vmatprep.mubr.f32.mxu0 %v1375_v0 }
  0x8f   : > { %516 = vmatmul.mubr.f32.gmra.mxu0 %v351_v2 }
  0x90   : > { %521 = vmatprep.mubr.f32.mxu0 %v1375_v0 }
  0x93   : > { %522 = vmatmul.mubr.f32.gmra.mxu0 %v352_v3 }
  0x94   : > { %527 = vmatprep.mubr.f32.mxu0 %v1375_v0 }
  0x97   : > { %528 = vmatmul.mubr.f32.gmra.mxu0 %v353_v4 }
  0x98   : > { %533 = vmatprep.mubr.f32.mxu0 %v1375_v0 }
  0x9b   : > { %534 = vmatmul.mubr.f32.gmra.mxu0 %v354_v5 }
  0x9c   : > { %539 = vmatprep.mubr.f32.mxu0 %v1375_v0 }
  0x9f   : > { %540 = vmatmul.mubr.f32.gmra.mxu0 %v355_v6 }
  0xa0   : > { %545 = vmatprep.mubr.f32.mxu0 %v1375_v0 }
  0xa3   : > { %546 = vmatmul.mubr.f32.gmra.mxu0 %v356_v7 }
  0xa4   : > { %551 = vmatprep.mubr.f32.mxu0 %v1375_v0 }
  0xa7   : > { %552 = vmatmul.mubr.f32.gmra.mxu0 %v357_v8 }
  0xa8   : > { %557 = vmatprep.mubr.f32.mxu0 %v1375_v0  ;;  %v394_v0 = vshrl.u32 %v393_v18, 7 }
  0xaa   : > { %v395_v19 = vsub.s32 0, %v394_v0  ;;  %v399_v21 = vsub.s32 1, %v394_v0 }
  0xab   : > { %558 = vmatmul.mubr.f32.gmra.mxu0 %v358_v9 }
  0xac   : > { %v1588_v22 = vrot.slane %v391_v20, %v395_v19  ;;  %v1590_v23 = vrot.slane %v391_v20, %v399_v21 }
 0x12f   : > { %v469_v24 = vpop.f32.mrf.mxu0 }
 0x130   : > { %v470_v25 = vadd.f32 %v469_v24, %v1588_v22 }
 0x131   : > { %v471_v26 = vpop.f32.mrf.mxu0 }
 0x132   : > { %v472_v27 = vadd.f32 %v471_v26, %v1590_v23  ;;  %v564_v30 = vmax.f32 %v470_v25, 0.0 }
 0x133   : > { %v475_v28 = vpop.f32.mrf.mxu0 }
 0x134   : > { %v565_v29 = vmax.f32 %v472_v27, 0.0  ;;  %v476_v31 = vadd.f32 %v475_v28, %v1588_v22 }
 0x135   : > { %v477_v32 = vpop.f32.mrf.mxu0 }
 0x136   : > { %v478_v33 = vadd.f32 %v477_v32, %v1590_v23  ;;  %708 = vmatprep.mubr.f32.mxu1 %v565_v29  ;;  %v566_v36 = vmax.f32 %v476_v31, 0.0 }
 0x137   : > { %v481_v34 = vpop.f32.mrf.mxu0  ;;  %709 = vmatmul.mubr.f32.vlgmr.msra.gmra.mxu1 %v564_v30 }
 0x138   : > { %v567_v35 = vmax.f32 %v478_v33, 0.0  ;;  %v482_v37 = vadd.f32 %v481_v34, %v1588_v22 }
 0x139   : > { %v483_v38 = vpop.f32.mrf.mxu0 }
 0x13a   : > { %v484_v39 = vadd.f32 %v483_v38, %v1590_v23  ;;  %713 = vmatprep.mubr.f32.mxu1 %v567_v35  ;;  %v568_v42 = vmax.f32 %v482_v37, 0.0 }
 0x13b   : > { %v487_v40 = vpop.f32.mrf.mxu0  ;;  %714 = vmatmul.mubr.f32.gmra.mxu1 %v566_v36 }
 0x13c   : > { %v569_v41 = vmax.f32 %v484_v39, 0.0  ;;  %v488_v43 = vadd.f32 %v487_v40, %v1588_v22 }
 0x13d   : > { %v489_v44 = vpop.f32.mrf.mxu0 }
 0x13e   : > { %v490_v45 = vadd.f32 %v489_v44, %v1590_v23  ;;  %718 = vmatprep.mubr.f32.mxu1 %v569_v41  ;;  %v570_v48 = vmax.f32 %v488_v43, 0.0 }
 0x13f   : > { %v493_v46 = vpop.f32.mrf.mxu0  ;;  %719 = vmatmul.mubr.f32.gmra.mxu1 %v568_v42 }
 0x140   : > { %v571_v47 = vmax.f32 %v490_v45, 0.0  ;;  %v494_v49 = vadd.f32 %v493_v46, %v1588_v22 }
 0x141   : > { %v495_v50 = vpop.f32.mrf.mxu0 }
 0x142   : > { %v496_v51 = vadd.f32 %v495_v50, %v1590_v23  ;;  %723 = vmatprep.mubr.f32.mxu1 %v571_v47  ;;  %v572_v54 = vmax.f32 %v494_v49, 0.0 }
 0x143   : > { %v499_v52 = vpop.f32.mrf.mxu0  ;;  %724 = vmatmul.mubr.f32.gmra.mxu1 %v570_v48 }
 0x144   : > { %v573_v53 = vmax.f32 %v496_v51, 0.0  ;;  %v500_v55 = vadd.f32 %v499_v52, %v1588_v22 }
 0x145   : > { %v501_v56 = vpop.f32.mrf.mxu0 }
 0x146   : > { %v502_v57 = vadd.f32 %v501_v56, %v1590_v23  ;;  %728 = vmatprep.mubr.f32.mxu1 %v573_v53  ;;  %v574_v60 = vmax.f32 %v500_v55, 0.0 }
 0x147   : > { %v505_v58 = vpop.f32.mrf.mxu0  ;;  %729 = vmatmul.mubr.f32.gmra.mxu1 %v572_v54 }
 0x148   : > { %v575_v59 = vmax.f32 %v502_v57, 0.0  ;;  %v506_v61 = vadd.f32 %v505_v58, %v1588_v22 }
 0x149   : > { %v507_v62 = vpop.f32.mrf.mxu0 }
 0x14a   : > { %v508_v63 = vadd.f32 %v507_v62, %v1590_v23  ;;  %733 = vmatprep.mubr.f32.mxu1 %v575_v59  ;;  %v576_v3 = vmax.f32 %v506_v61, 0.0 }
 0x14b   : > { %v511_v1 = vpop.f32.mrf.mxu0  ;;  %734 = vmatmul.mubr.f32.gmra.mxu1 %v574_v60  ;;  %v1627_v60 = vld [vmem:[%s1724_s4] ss:$0 sm:$0xff] }
 0x14c   : > { %v577_v2 = vmax.f32 %v508_v63, 0.0  ;;  %v512_v4 = vadd.f32 %v511_v1, %v1588_v22 }
 0x14d   : > { %v513_v5 = vpop.f32.mrf.mxu0 }
 0x14e   : > { %v514_v6 = vadd.f32 %v513_v5, %v1590_v23  ;;  %738 = vmatprep.mubr.f32.mxu1 %v577_v2  ;;  %v578_v9 = vmax.f32 %v512_v4, 0.0 }
 0x14f   : > { %v517_v7 = vpop.f32.mrf.mxu0  ;;  %739 = vmatmul.mubr.f32.gmra.mxu1 %v576_v3 }
 0x150   : > { %v579_v8 = vmax.f32 %v514_v6, 0.0  ;;  %v518_v10 = vadd.f32 %v517_v7, %v1588_v22 }
 0x151   : > { %v519_v11 = vpop.f32.mrf.mxu0 }
 0x152   : > { %v520_v12 = vadd.f32 %v519_v11, %v1590_v23  ;;  %743 = vmatprep.mubr.f32.mxu1 %v579_v8  ;;  %v580_v15 = vmax.f32 %v518_v10, 0.0 }
 0x153   : > { %v523_v13 = vpop.f32.mrf.mxu0  ;;  %744 = vmatmul.mubr.f32.gmra.mxu1 %v578_v9 }
 0x154   : > { %v581_v14 = vmax.f32 %v520_v12, 0.0  ;;  %v524_v16 = vadd.f32 %v523_v13, %v1588_v22 }
 0x155   : > { %v525_v17 = vpop.f32.mrf.mxu0 }
 0x156   : > { %v526_v18 = vadd.f32 %v525_v17, %v1590_v23  ;;  %748 = vmatprep.mubr.f32.mxu1 %v581_v14  ;;  %v582_v20 = vmax.f32 %v524_v16, 0.0 }
 0x157   : > { %v529_v0 = vpop.f32.mrf.mxu0  ;;  %749 = vmatmul.mubr.f32.gmra.mxu1 %v580_v15 }
 0x158   : > { %v583_v19 = vmax.f32 %v526_v18, 0.0  ;;  %v530_v21 = vadd.f32 %v529_v0, %v1588_v22 }
 0x159   : > { %v531_v24 = vpop.f32.mrf.mxu0 }
 0x15a   : > { %v532_v25 = vadd.f32 %v531_v24, %v1590_v23  ;;  %753 = vmatprep.mubr.f32.mxu1 %v583_v19  ;;  %v584_v28 = vmax.f32 %v530_v21, 0.0 }
 0x15b   : > { %v535_v26 = vpop.f32.mrf.mxu0  ;;  %754 = vmatmul.mubr.f32.gmra.mxu1 %v582_v20 }
 0x15c   : > { %v585_v27 = vmax.f32 %v532_v25, 0.0  ;;  %v536_v29 = vadd.f32 %v535_v26, %v1588_v22 }
 0x15d   : > { %v537_v30 = vpop.f32.mrf.mxu0 }
 0x15e   : > { %v538_v31 = vadd.f32 %v537_v30, %v1590_v23  ;;  %758 = vmatprep.mubr.f32.mxu1 %v585_v27  ;;  %v586_v34 = vmax.f32 %v536_v29, 0.0 }
 0x15f   : > { %v541_v32 = vpop.f32.mrf.mxu0  ;;  %759 = vmatmul.mubr.f32.gmra.mxu1 %v584_v28 }
 0x160   : > { %v587_v33 = vmax.f32 %v538_v31, 0.0  ;;  %v542_v35 = vadd.f32 %v541_v32, %v1588_v22 }
 0x161   : > { %v543_v36 = vpop.f32.mrf.mxu0 }
 0x162   : > { %v544_v37 = vadd.f32 %v543_v36, %v1590_v23  ;;  %763 = vmatprep.mubr.f32.mxu1 %v587_v33  ;;  %v588_v40 = vmax.f32 %v542_v35, 0.0 }
 0x163   : > { %v547_v38 = vpop.f32.mrf.mxu0  ;;  %764 = vmatmul.mubr.f32.gmra.mxu1 %v586_v34 }
 0x164   : > { %v589_v39 = vmax.f32 %v544_v37, 0.0  ;;  %v548_v41 = vadd.f32 %v547_v38, %v1588_v22 }
 0x165   : > { %v549_v42 = vpop.f32.mrf.mxu0 }
 0x166   : > { %v550_v43 = vadd.f32 %v549_v42, %v1590_v23  ;;  %768 = vmatprep.mubr.f32.mxu1 %v589_v39  ;;  %v590_v46 = vmax.f32 %v548_v41, 0.0 }
 0x167   : > { %v553_v44 = vpop.f32.mrf.mxu0  ;;  %769 = vmatmul.mubr.f32.gmra.mxu1 %v588_v40 }
 0x168   : > { %v591_v45 = vmax.f32 %v550_v43, 0.0  ;;  %v554_v47 = vadd.f32 %v553_v44, %v1588_v22 }
 0x169   : > { %v555_v48 = vpop.f32.mrf.mxu0 }
 0x16a   : > { %v556_v49 = vadd.f32 %v555_v48, %v1590_v23  ;;  %773 = vmatprep.mubr.f32.mxu1 %v591_v45  ;;  %v592_v52 = vmax.f32 %v554_v47, 0.0 }
 0x16b   : > { %v559_v50 = vpop.f32.mrf.mxu0  ;;  %774 = vmatmul.mubr.f32.gmra.mxu1 %v590_v46 }
 0x16c   : > { %v593_v51 = vmax.f32 %v556_v49, 0.0  ;;  %v560_v53 = vadd.f32 %v559_v50, %v1588_v22 }
 0x16d   : > { %v561_v54 = vpop.f32.mrf.mxu0 }
 0x16e   : > { %v562_v55 = vadd.f32 %v561_v54, %v1590_v23  ;;  %778 = vmatprep.mubr.f32.mxu1 %v593_v51  ;;  %v594_v57 = vmax.f32 %v560_v53, 0.0 }
 0x16f   : > { %779 = vmatmul.mubr.f32.gmra.mxu1 %v592_v52 }
 0x170   : > { %v595_v56 = vmax.f32 %v562_v55, 0.0 }
 0x172   : > { %783 = vmatprep.mubr.f32.mxu1 %v595_v56 }
 0x173   : > { %784 = vmatmul.mubr.f32.gmra.mxu1 %v594_v57 }
 0x1f7   : > { %v1064_v58 = vpop.f32.mrf.mxu1 }
 0x1f9   : > { %v1065_v59 = vpop.f32.mrf.mxu1 }
 0x1fa   : > { %v1066_v61 = vadd.f32 %v1065_v59, %v1064_v58 }
 0x1fb   : > { %v1067_v62 = vpop.f32.mrf.mxu1 }
 0x1fc   : > { %v847_v22 = vadd.f32 %v1066_v61, %v1627_v60 }
 0x1fd   : > { %v1068_v63 = vpop.f32.mrf.mxu1 }
 0x1fe   : > { %863 = vst [vmem:[%s1632_s24] sm:$0xff] %v847_v22  ;;  %v1069_v23 = vadd.f32 %v1068_v63, %v1067_v62 }
 0x1ff   : > { %v1070_v1 = vpop.f32.mrf.mxu1 }
 0x200   : > { %v848_v2 = vadd.f32 %v1069_v23, %v1627_v60 }
 0x201   : > { %v1071_v3 = vpop.f32.mrf.mxu1 }
 0x202   : > { %864 = vst [vmem:[%s1632_s24 + $0x8] sm:$0xff] %v848_v2  ;;  %v1072_v4 = vadd.f32 %v1071_v3, %v1070_v1 }
 0x203   : > { %v1073_v5 = vpop.f32.mrf.mxu1 }
 0x204   : > { %v849_v6 = vadd.f32 %v1072_v4, %v1627_v60 }
 0x205   : > { %v1074_v7 = vpop.f32.mrf.mxu1 }
 0x206   : > { %865 = vst [vmem:[%s1632_s24 + $0x10] sm:$0xff] %v849_v6  ;;  %v1075_v8 = vadd.f32 %v1074_v7, %v1073_v5 }
 0x207   : > { %v1076_v9 = vpop.f32.mrf.mxu1 }
 0x208   : > { %v850_v10 = vadd.f32 %v1075_v8, %v1627_v60 }
 0x209   : > { %v1077_v11 = vpop.f32.mrf.mxu1 }
 0x20a   : > { %866 = vst [vmem:[%s1632_s24 + $0x18] sm:$0xff] %v850_v10  ;;  %v1078_v12 = vadd.f32 %v1077_v11, %v1076_v9 }
 0x20b   : > { %v1079_v13 = vpop.f32.mrf.mxu1 }
 0x20c   : > { %v851_v14 = vadd.f32 %v1078_v12, %v1627_v60 }
 0x20d   : > { %v1080_v15 = vpop.f32.mrf.mxu1 }
 0x20e   : > { %867 = vst [vmem:[%s1632_s24 + $0x20] sm:$0xff] %v851_v14  ;;  %v1081_v16 = vadd.f32 %v1080_v15, %v1079_v13 }
 0x20f   : > { %v1082_v17 = vpop.f32.mrf.mxu1 }
 0x210   : > { %v852_v18 = vadd.f32 %v1081_v16, %v1627_v60 }
 0x211   : > { %v1083_v0 = vpop.f32.mrf.mxu1 }
 0x212   : > { %868 = vst [vmem:[%s1632_s24 + $0x28] sm:$0xff] %v852_v18  ;;  %v1084_v19 = vadd.f32 %v1083_v0, %v1082_v17 }
 0x213   : > { %v1085_v20 = vpop.f32.mrf.mxu1 }
 0x214   : > { %v853_v21 = vadd.f32 %v1084_v19, %v1627_v60 }
 0x215   : > { %v1086_v24 = vpop.f32.mrf.mxu1 }
 0x216   : > { %869 = vst [vmem:[%s1632_s24 + $0x30] sm:$0xff] %v853_v21  ;;  %v1087_v25 = vadd.f32 %v1086_v24, %v1085_v20 }
 0x217   : > { %v1088_v26 = vpop.f32.mrf.mxu1 }
 0x218   : > { %v854_v27 = vadd.f32 %v1087_v25, %v1627_v60 }
 0x219   : > { %v1089_v28 = vpop.f32.mrf.mxu1 }
 0x21a   : > { %870 = vst [vmem:[%s1632_s24 + $0x38] sm:$0xff] %v854_v27  ;;  %v1090_v29 = vadd.f32 %v1089_v28, %v1088_v26 }
 0x21b   : > { %v1091_v30 = vpop.f32.mrf.mxu1 }
 0x21c   : > { %v855_v31 = vadd.f32 %v1090_v29, %v1627_v60 }
 0x21d   : > { %v1092_v32 = vpop.f32.mrf.mxu1 }
 0x21e   : > { %871 = vst [vmem:[%s1632_s24 + $0x40] sm:$0xff] %v855_v31  ;;  %v1093_v33 = vadd.f32 %v1092_v32, %v1091_v30 }
 0x21f   : > { %v1094_v34 = vpop.f32.mrf.mxu1 }
 0x220   : > { %v856_v35 = vadd.f32 %v1093_v33, %v1627_v60 }
 0x221   : > { %v1095_v36 = vpop.f32.mrf.mxu1 }
 0x222   : > { %872 = vst [vmem:[%s1632_s24 + $0x48] sm:$0xff] %v856_v35  ;;  %v1096_v37 = vadd.f32 %v1095_v36, %v1094_v34 }
 0x223   : > { %v1097_v38 = vpop.f32.mrf.mxu1 }
 0x224   : > { %v857_v39 = vadd.f32 %v1096_v37, %v1627_v60 }
 0x225   : > { %v1098_v40 = vpop.f32.mrf.mxu1 }
 0x226   : > { %873 = vst [vmem:[%s1632_s24 + $0x50] sm:$0xff] %v857_v39  ;;  %v1099_v41 = vadd.f32 %v1098_v40, %v1097_v38 }
 0x227   : > { %v1100_v42 = vpop.f32.mrf.mxu1 }
 0x228   : > { %v858_v43 = vadd.f32 %v1099_v41, %v1627_v60 }
 0x229   : > { %v1101_v44 = vpop.f32.mrf.mxu1 }
 0x22a   : > { %874 = vst [vmem:[%s1632_s24 + $0x58] sm:$0xff] %v858_v43  ;;  %v1102_v45 = vadd.f32 %v1101_v44, %v1100_v42 }
 0x22b   : > { %v1103_v46 = vpop.f32.mrf.mxu1 }
 0x22c   : > { %v859_v47 = vadd.f32 %v1102_v45, %v1627_v60 }
 0x22d   : > { %v1104_v48 = vpop.f32.mrf.mxu1 }
 0x22e   : > { %875 = vst [vmem:[%s1632_s24 + $0x60] sm:$0xff] %v859_v47  ;;  %v1105_v49 = vadd.f32 %v1104_v48, %v1103_v46 }
 0x22f   : > { %v1106_v50 = vpop.f32.mrf.mxu1 }
 0x230   : > { %v860_v51 = vadd.f32 %v1105_v49, %v1627_v60 }
 0x231   : > { %v1107_v52 = vpop.f32.mrf.mxu1 }
 0x232   : > { %876 = vst [vmem:[%s1632_s24 + $0x68] sm:$0xff] %v860_v51  ;;  %v1108_v53 = vadd.f32 %v1107_v52, %v1106_v50 }
 0x233   : > { %v1109_v54 = vpop.f32.mrf.mxu1 }
 0x234   : > { %v861_v55 = vadd.f32 %v1108_v53, %v1627_v60 }
 0x235   : > { %v1110_v56 = vpop.f32.mrf.mxu1 }
 0x236   : > { %877 = vst [vmem:[%s1632_s24 + $0x70] sm:$0xff] %v861_v55  ;;  %v1111_v57 = vadd.f32 %v1110_v56, %v1109_v54 }
 0x238   : > { %v862_v58 = vadd.f32 %v1111_v57, %v1627_v60 }
 0x23a   : > { %878 = vst [vmem:[%s1632_s24 + $0x78] sm:$0xff] %v862_v58 }
 0x23b   : > { %1295 = shalt.err (!%p1292_p5)
}
 0x23c   : > { %s1296_s6 = scalar_lea.hbm %s1668_s13, 2048  ;;  %s1300_s30 = scalar_lea.hbm %s1725_s5, 4096 }
 0x23d   : > { %p1297_p10 = scmp.ne.s32.totalorder %s1668_s13, %s1296_s6  ;;  %p1301_p6 = scmp.lt.s32.totalorder %s1668_s13, %s1725_s5 }
 0x23e   : > { %p1302_p12 = scmp.lt.s32.totalorder %s1300_s30, %s1296_s6 }
 0x23f   : > { %p1298_p1 = pnand %p1297_p10, %p1507_p7 }
 0x240   : > { %p1303_p3 = por %p1302_p12, %p1301_p6 }
 0x241   : > { %p1299_p4 = pneg %p1298_p1 }
 0x243   : > { %p1304_p8 = pnand %p1303_p3, %p1299_p4 }
 0x245   : > { %1307 = shalt.err (!%p1304_p8)
}
 0x246   : > { %s1377_s25 = smov 128   ;;  %s1378_s11 = smov 8  }
 0x247   : > { %1122 = dma.vmem_to_hbm [thread:$0]  (%p1507_p7), %s1670_s27, 2048, %s1668_s13, %s880_s10, %s1377_s25, %s1377_s25, %s1378_s11  }
 0x248 PF: > { %s908_s9 = sand.u32 1, %s1346_s18   ;;  %p1745_p9 = scmp.ne.s32.totalorder %s1735_s29, 0 }
 0x249   : > { %p1746_p11 = scmp.ge.s32.totalorder %s1366_s23, 2  ;;  %s909_s15 = scalar_lea.sflag [#allocation5], %s908_s9 }
 0x24b   : > { %p1136_p2 = pnand %p1746_p11, %p1745_p9 }
 0x24d   : > { %p1137_p13 = pneg %p1136_p2 }
 0x24f   : > { %1341 = dma.done.wait (%p1137_p13), %s909_s15, 2048  }
 0x250   : > { %1343 = vsyncadd (%p1137_p13), %s909_s15, 4294965248  ;;  %s22_s23 = sadd.s32 1, %s1366_s23   ;;  %s1747_s18 = smov %s1350_s19 }
 0x251   : > { %p19_p0 = scmp.ge.s32.totalorder %s22_s23, 4   ;;  %s1748_s19 = smov %s1354_s20 }
 0x252   : > { %s1749_s20 = smov %s1516_s14  ;;  %s1750_s21 = smov %s1362_s22 }
 0x253   : > { %s1751_s22 = smov %s1753_s7  ;;  %21 = sbr.rel (!%p19_p0) target bundleno = 9 (0x9), region = 106 }
 0x258   :  { %914 = vsyncpa [#allocation4], 1 }
 0x259   :  { %916 = vsyncpa [#allocation4 + $0x1], 1 }
 0x25a   :  { %917 = vsyncpa [#allocation7], 1 }
 0x25b   :  { %918 = vsyncpa [#allocation5], 1 }
 0x25c   :  { %920 = vsyncpa [#allocation5 + $0x1], 1 }

</bundles_post_ra>
